<compile_context>
chip_gen: v7x
topology: tpu7x:2x2x1
jax: 0.10.0
libtpu: 0.0.40
codegen_flags: <defaults>
</compile_context>

<pallas_src>
import functools

import jax
import jax.numpy as jnp
from jax import lax
from jax.experimental import pallas as pl
from jax.experimental.pallas import tpu as pltpu


_TILE_N_FWD = 512            # batch-tile cap for the 1-stream forward kernel
_TILE_N_JVP = 256            # batch-tile cap for the 2-stream fused JVP kernel
_TILE_C_MAX = 2048           # class tile (multiple of 128) for large vocabularies
_VMEM_MARGIN = 8 * 1024 * 1024


@functools.lru_cache(maxsize=1)
def _vmem_limit_bytes():
    """Per-generation scoped-VMEM cap: ~48 MiB on 128 MiB parts, ~32 MiB on v7x."""
    cap = 128 * 1024 * 1024
    try:
        cap = int(pltpu.get_tpu_info().vmem_capacity_bytes)
    except Exception:
        pass
    return int(min(48 * 1024 * 1024, cap // 2))


def _choose_tiles(n, c, *, n_streams, itemsize, tile_n_cap, tile_c_cap):
    """Pick (tile_n, tile_c) against the real VMEM peak.

    Budget = double-buffered input streams (at the input dtype) plus the live
    (TN, TC) f32 elementwise temporaries Mosaic materializes in the body.
    """
    tile_c = c if c <= tile_c_cap else tile_c_cap
    budget = max(8 * 1024 * 1024, _vmem_limit_bytes() - _VMEM_MARGIN)
    temps_f32 = 3 + 2 * n_streams                      # live f32 body temporaries
    per_row = tile_c * (2 * n_streams * itemsize + temps_f32 * 4)
    tile_n = min(tile_n_cap, max(8, budget // per_row))
    if tile_n >= n:
        if n >= 16:
            # Split into >= 2 batch tiles so dimension_semantics=("parallel", ...)
            # can shard the batch axis across both v7x TensorCores. Free on
            # single-TC v5e/v6e.
            tile_n = -(-((n + 1) // 2) // 8) * 8       # round8(ceil(n/2))
        else:
            tile_n = n                                 # full dim: always layout-legal
    else:
        tile_n = max(8, (tile_n // 8) * 8)             # keep (8,128) sublane alignment
    return int(tile_n), int(tile_c)


def _ce_fwd_kernel(x_ref, y_ref, loss_ref, *scratch, num_classes, tile_c,
                   num_class_tiles, ragged_last, scale):
    """Per-sample CE. grid=(batch tiles, class tiles), online logsumexp over classes."""
    y = y_ref[...]                                      # (TN, 1) int32
    x = x_ref[...].astype(jnp.float32)                  # (TN, TC)
    iota = lax.broadcasted_iota(jnp.int32, x.shape, 1)  # constant 0..TC-1 per lane

    if num_class_tiles == 1:
        # Single class tile: plain one-pass softmax, no online bookkeeping.
        m = jnp.max(x, axis=-1, keepdims=True)
        p = jnp.exp(x - m)
        l = jnp.sum(p, axis=-1, keepdims=True)
        tx = jnp.sum(jnp.where(iota == y, x, 0.0), axis=-1, keepdims=True)
        loss_ref[...] = ((m + jnp.log(l)) - tx) * scale
        return

    m_sc, l_sc, tx_sc = scratch
    c = pl.program_id(1)

    @pl.when(c == 0)
    def _():
        m_sc[...] = jnp.full(m_sc.shape, -jnp.inf, m_sc.dtype)
        l_sc[...] = jnp.zeros(l_sc.shape, l_sc.dtype)
        tx_sc[...] = jnp.zeros(tx_sc.shape, tx_sc.dtype)

    # Class offset applied to the (TN,1)/scalar side; iota stays constant.
    y_local = y - c * tile_c
    hit = iota == y_local
    if ragged_last:
        # Only needed when C % tile_c != 0: mask the (OOB) tail lanes so garbage
        # columns of the last class tile cannot pollute max / sum.
        xm = jnp.where(iota < (num_classes - c * tile_c), x, -jnp.inf)
    else:
        xm = x

    m_prev = m_sc[...]
    m_new = jnp.maximum(m_prev, jnp.max(xm, axis=-1, keepdims=True))
    alpha = jnp.exp(m_prev - m_new)
    p = jnp.exp(xm - m_new)
    l_sc[...] = alpha * l_sc[...] + jnp.sum(p, axis=-1, keepdims=True)
    tx_sc[...] += jnp.sum(jnp.where(hit, x, 0.0), axis=-1, keepdims=True)
    m_sc[...] = m_new

    @pl.when(c == num_class_tiles - 1)
    def _():
        loss_ref[...] = ((m_sc[...] + jnp.log(l_sc[...])) - tx_sc[...]) * scale


def _ce_jvp_kernel(x_ref, t_ref, y_ref, loss_ref, jvp_ref, *scratch, num_classes,
                   tile_c, num_class_tiles, ragged_last, scale):
    """Fused CE/N primal + tangent (softmax.t - t[y])/N, one streaming pass over x,t."""
    y = y_ref[...]                                      # (TN, 1) int32
    x = x_ref[...].astype(jnp.float32)                  # (TN, TC)
    t = t_ref[...].astype(jnp.float32)                  # (TN, TC)
    iota = lax.broadcasted_iota(jnp.int32, x.shape, 1)

    if num_class_tiles == 1:
        hit = iota == y
        m = jnp.max(x, axis=-1, keepdims=True)
        p = jnp.exp(x - m)
        l = jnp.sum(p, axis=-1, keepdims=True)
        tx = jnp.sum(jnp.where(hit, x, 0.0), axis=-1, keepdims=True)
        tt = jnp.sum(jnp.where(hit, t, 0.0), axis=-1, keepdims=True)
        sd = jnp.sum(p * t, axis=-1, keepdims=True)
        inv_l = pl.reciprocal(l, approx=True)
        loss_ref[...] = ((m + jnp.log(l)) - tx) * scale
        jvp_ref[...] = (sd * inv_l - tt) * scale
        return

    m_sc, l_sc, tx_sc, sd_sc, tt_sc = scratch
    c = pl.program_id(1)

    @pl.when(c == 0)
    def _():
        m_sc[...] = jnp.full(m_sc.shape, -jnp.inf, m_sc.dtype)
        l_sc[...] = jnp.zeros(l_sc.shape, l_sc.dtype)
        tx_sc[...] = jnp.zeros(tx_sc.shape, tx_sc.dtype)
        sd_sc[...] = jnp.zeros(sd_sc.shape, sd_sc.dtype)
        tt_sc[...] = jnp.zeros(tt_sc.shape, tt_sc.dtype)

    y_local = y - c * tile_c
    hit = iota == y_local
    if ragged_last:
        valid = iota < (num_classes - c * tile_c)
        xm = jnp.where(valid, x, -jnp.inf)
        tm = jnp.where(valid, t, 0.0)
    else:
        xm = x
        tm = t

    m_prev = m_sc[...]
    m_new = jnp.maximum(m_prev, jnp.max(xm, axis=-1, keepdims=True))
    alpha = jnp.exp(m_prev - m_new)
    p = jnp.exp(xm - m_new)
    l_sc[...] = alpha * l_sc[...] + jnp.sum(p, axis=-1, keepdims=True)
    sd_sc[...] = alpha * sd_sc[...] + jnp.sum(p * tm, axis=-1, keepdims=True)
    tx_sc[...] += jnp.sum(jnp.where(hit, x, 0.0), axis=-1, keepdims=True)
    tt_sc[...] += jnp.sum(jnp.where(hit, tm, 0.0), axis=-1, keepdims=True)
    m_sc[...] = m_new

    @pl.when(c == num_class_tiles - 1)
    def _():
        l = l_sc[...]
        inv_l = pl.reciprocal(l, approx=True)
        loss_ref[...] = ((m_sc[...] + jnp.log(l)) - tx_sc[...]) * scale
        jvp_ref[...] = (sd_sc[...] * inv_l - tt_sc[...]) * scale


def _pallas_ce(x, y2, scale, tile_c_cap=_TILE_C_MAX):
    n, c = x.shape
    tn, tc = _choose_tiles(n, c, n_streams=1, itemsize=x.dtype.itemsize,
                           tile_n_cap=_TILE_N_FWD, tile_c_cap=tile_c_cap)
    gn, gc = pl.cdiv(n, tn), pl.cdiv(c, tc)
    ragged_last = (c % tc) != 0
    kernel = functools.partial(_ce_fwd_kernel, num_classes=c, tile_c=tc,
                               num_class_tiles=gc, ragged_last=ragged_last,
                               scale=float(scale))
    scratch = [] if gc == 1 else [pltpu.VMEM((tn, 1), jnp.float32)] * 3
    out = pl.pallas_call(
        kernel,
        out_shape=jax.ShapeDtypeStruct((gn * tn, 1), jnp.float32),
        grid_spec=pltpu.PrefetchScalarGridSpec(
            num_scalar_prefetch=0,
            grid=(gn, gc),
            in_specs=[
                pl.BlockSpec((tn, tc), lambda i, k: (i, k)),
                pl.BlockSpec((tn, 1), lambda i, k: (i, 0)),
            ],
            out_specs=pl.BlockSpec((tn, 1), lambda i, k: (i, 0)),
            scratch_shapes=scratch,
        ),
        compiler_params=pltpu.CompilerParams(
            dimension_semantics=("parallel", "arbitrary"),
            vmem_limit_bytes=_vmem_limit_bytes(),
        ),
        cost_estimate=pl.CostEstimate(
            flops=6 * n * c,
            transcendentals=n * c + n,
            bytes_accessed=n * c * x.dtype.itemsize + 2 * n * 4,
        ),
    )(x, y2)
    # NOTE: ragged batch tiles read OOB rows from HBM; any resulting inf/NaN lives
    # only in padded rows and is discarded by the [:n] slice below.
    return out.reshape(-1)[:n]


def _pallas_ce_jvp(x, t, y2, scale, tile_c_cap=_TILE_C_MAX):
    n, c = x.shape
    tn, tc = _choose_tiles(n, c, n_streams=2, itemsize=x.dtype.itemsize,
                           tile_n_cap=_TILE_N_JVP, tile_c_cap=tile_c_cap)
    gn, gc = pl.cdiv(n, tn), pl.cdiv(c, tc)
    ragged_last = (c % tc) != 0
    kernel = functools.partial(_ce_jvp_kernel, num_classes=c, tile_c=tc,
                               num_class_tiles=gc, ragged_last=ragged_last,
                               scale=float(scale))
    scratch = [] if gc == 1 else [pltpu.VMEM((tn, 1), jnp.float32)] * 5
    loss, jvp_out = pl.pallas_call(
        kernel,
        out_shape=(jax.ShapeDtypeStruct((gn * tn, 1), jnp.float32),
                   jax.ShapeDtypeStruct((gn * tn, 1), jnp.float32)),
        grid_spec=pltpu.PrefetchScalarGridSpec(
            num_scalar_prefetch=0,
            grid=(gn, gc),
            in_specs=[
                pl.BlockSpec((tn, tc), lambda i, k: (i, k)),
                pl.BlockSpec((tn, tc), lambda i, k: (i, k)),
                pl.BlockSpec((tn, 1), lambda i, k: (i, 0)),
            ],
            out_specs=(pl.BlockSpec((tn, 1), lambda i, k: (i, 0)),
                       pl.BlockSpec((tn, 1), lambda i, k: (i, 0))),
            scratch_shapes=scratch,
        ),
        compiler_params=pltpu.CompilerParams(
            dimension_semantics=("parallel", "arbitrary"),
            vmem_limit_bytes=_vmem_limit_bytes(),
        ),
        cost_estimate=pl.CostEstimate(
            flops=10 * n * c,
            transcendentals=n * c + n,
            bytes_accessed=n * c * (x.dtype.itemsize + t.dtype.itemsize) + 3 * n * 4,
        ),
    )(x, t, y2)
    return loss.reshape(-1)[:n], jvp_out.reshape(-1)[:n]


# ---------------- public API matching the PyTorch module ----------------

def cross_entropy_none(x, y):
    """forward(): per-sample CE loss, reduction='none'."""
    # TODO(synk): nn.CrossEntropyLoss's ignore_index / label_smoothing options are
    # not modeled; targets are assumed to be valid class indices in [0, C).
    y2 = jnp.asarray(y, jnp.int32).reshape(-1, 1)
    return _pallas_ce(x, y2, scale=1.0)


@jax.custom_jvp
def _ce_mean_scaled(x, y2):
    # self.func(x) = CrossEntropyLoss(reduction='none')(x, y) / N
    return _pallas_ce(x, y2, scale=1.0 / x.shape[0])


@_ce_mean_scaled.defjvp
def _ce_mean_scaled_jvp(primals, tangents):
    x, y2 = primals
    tx, _ = tangents            # integer-label tangent is a float0 zero -> ignored
    return _pallas_ce_jvp(x, tx, y2, scale=1.0 / x.shape[0])


def jvp_forward(x_in, jvp_in, y):
    """Module.jvp_forward: (CE/N, d(CE/N).jvp_in), one fused HBM pass over x / jvp_in."""
    y2 = jnp.asarray(y, jnp.int32).reshape(-1, 1)
    return jax.jvp(lambda x: _ce_mean_scaled(x, y2), (x_in,), (jvp_in,))


if __name__ == "__main__":
    key = jax.random.PRNGKey(0)
    kx, ky, kt = jax.random.split(key, 3)

    # Primary small shapes implied by the module: logits (N, C), labels (N,).
    N, C = 8, 32
    x = jax.random.normal(kx, (N, C), dtype=jnp.float32)
    y = jax.random.randint(ky, (N,), 0, C, dtype=jnp.int32)
    t = jax.random.normal(kt, (N, C), dtype=jnp.float32)

    # forward(): per-sample cross entropy (single-class-tile fast path).
    loss = cross_entropy_none(x, y)
    jax.block_until_ready(loss)
    ref_loss = -jax.nn.log_softmax(x, axis=-1)[jnp.arange(N), y]
    assert jnp.allclose(loss, ref_loss, atol=1e-5, rtol=1e-5), (loss, ref_loss)

    # jvp_forward(): fused primal + tangent of CE/N.
    out, jvp_out = jvp_forward(x, t, y)
    jax.block_until_ready((out, jvp_out))
    ref_fn = lambda z: -jax.nn.log_softmax(z, axis=-1)[jnp.arange(N), y] / N
    ref_out, ref_jvp = jax.jvp(ref_fn, (x,), (t,))
    assert jnp.allclose(out, ref_out, atol=1e-5, rtol=1e-5), (out, ref_out)
    assert jnp.allclose(jvp_out, ref_jvp, atol=2e-4, rtol=2e-3), (jvp_out, ref_jvp)

    # Also exercise the multi-class-tile (online logsumexp) + ragged paths with a
    # forced small class tile: C=320 / tile_c=128 -> 3 class tiles (last ragged),
    # N=24 -> 2 batch tiles (ragged batch tail reads OOB rows, discarded).
    N2, C2 = 24, 320
    x2 = jax.random.normal(kx, (N2, C2), dtype=jnp.float32)
    lab2 = jax.random.randint(ky, (N2,), 0, C2, dtype=jnp.int32)
    t2 = jax.random.normal(kt, (N2, C2), dtype=jnp.float32)
    lab2c = lab2.reshape(-1, 1)
    l2 = _pallas_ce(x2, lab2c, scale=1.0, tile_c_cap=128)
    l2j, j2 = _pallas_ce_jvp(x2, t2, lab2c, scale=1.0 / N2, tile_c_cap=128)
    jax.block_until_ready((l2, l2j, j2))
    ref_l2 = -jax.nn.log_softmax(x2, axis=-1)[jnp.arange(N2), lab2]
    sm2 = jax.nn.softmax(x2, axis=-1)
    ref_j2 = (jnp.sum(sm2 * t2, axis=-1) - t2[jnp.arange(N2), lab2]) / N2
    assert jnp.allclose(l2, ref_l2, atol=1e-5, rtol=1e-5), (l2, ref_l2)
    assert jnp.allclose(l2j, ref_l2 / N2, atol=1e-6, rtol=1e-5), (l2j, ref_l2 / N2)
    assert jnp.allclose(j2, ref_j2, atol=2e-4, rtol=2e-3), (j2, ref_j2)

    print("KERNEL_OK")
</pallas_src>

<mosaic_0001>
module attributes {stable_mosaic.version = 11 : i64} {
  func.func @_ce_fwd_kernel(%arg0: i32, %arg1: i32, %arg2: memref<8x32xf32, #tpu.memory_space<vmem>>, %arg3: memref<8x1xi32, #tpu.memory_space<vmem>>, %arg4: memref<8x1xf32, #tpu.memory_space<vmem>>) attributes {dimension_semantics = [#tpu.dimension_semantics<parallel>, #tpu.dimension_semantics<arbitrary>], iteration_bounds = array<i64: 1, 1>, scalar_prefetch = 0 : i64, scratch_operands = 0 : i64, tpu.core_type = #tpu.core_type<tc>, window_params = [{transform_indices = @transform_0, window_bounds = array<i64: 8, 32>}, {transform_indices = @transform_1, window_bounds = array<i64: 8, 1>}, {transform_indices = @transform_2, window_bounds = array<i64: 8, 1>}]} {
    %c0 = arith.constant 0 : index
    %c0_0 = arith.constant 0 : index
    %0 = vector.load %arg3[%c0, %c0_0] : memref<8x1xi32, #tpu.memory_space<vmem>>, vector<8x1xi32>
    %c0_1 = arith.constant 0 : index
    %c0_2 = arith.constant 0 : index
    %1 = vector.load %arg2[%c0_1, %c0_2] : memref<8x32xf32, #tpu.memory_space<vmem>>, vector<8x32xf32>
    %2 = tpu.iota {dimensions = array<i32: 1>} : vector<8x32xi32>
    %cst = arith.constant dense<0xFF800000> : vector<8xf32>
    %3 = vector.multi_reduction <maximumf>, %1, %cst [1] : vector<8x32xf32> to vector<8xf32>
    %4 = vector.shape_cast %3 : vector<8xf32> to vector<8x1xf32>
    %5 = vector.broadcast %4 : vector<8x1xf32> to vector<8x32xf32>
    %6 = arith.subf %1, %5 : vector<8x32xf32>
    %7 = math.exp %6 : vector<8x32xf32>
    %cst_3 = arith.constant dense<0.000000e+00> : vector<8xf32>
    %8 = vector.multi_reduction <add>, %7, %cst_3 [1] : vector<8x32xf32> to vector<8xf32>
    %9 = vector.shape_cast %8 : vector<8xf32> to vector<8x1xf32>
    %10 = vector.broadcast %0 : vector<8x1xi32> to vector<8x32xi32>
    %11 = arith.cmpi eq, %2, %10 : vector<8x32xi32>
    %cst_4 = arith.constant 0.000000e+00 : f32
    %12 = vector.broadcast %cst_4 : f32 to vector<8x32xf32>
    %13 = arith.select %11, %1, %12 : vector<8x32xi1>, vector<8x32xf32>
    %cst_5 = arith.constant dense<0.000000e+00> : vector<8xf32>
    %14 = vector.multi_reduction <add>, %13, %cst_5 [1] : vector<8x32xf32> to vector<8xf32>
    %15 = vector.shape_cast %14 : vector<8xf32> to vector<8x1xf32>
    %16 = math.log %9 : vector<8x1xf32>
    %17 = arith.addf %4, %16 : vector<8x1xf32>
    %18 = arith.subf %17, %15 : vector<8x1xf32>
    %cst_6 = arith.constant 1.000000e+00 : f32
    %19 = vector.broadcast %cst_6 : f32 to vector<8x1xf32>
    %20 = arith.mulf %18, %19 : vector<8x1xf32>
    %c0_7 = arith.constant 0 : index
    %c0_8 = arith.constant 0 : index
    %21 = vector.load %arg4[%c0_7, %c0_8] : memref<8x1xf32, #tpu.memory_space<vmem>>, vector<8x1xf32>
    tpu.vector_store %arg4[%c0_7, %c0_8], %20 {strides = array<i32>} : memref<8x1xf32, #tpu.memory_space<vmem>>, vector<8x1xf32>,
    return
  }
  func.func @transform_0(%arg0: i32, %arg1: i32) -> (i32, i32) {
    %c0_i32 = arith.constant 0 : i32
    return %arg0, %arg1 : i32, i32
  }
  func.func @transform_1(%arg0: i32, %arg1: i32) -> (i32, i32) {
    %c0_i32 = arith.constant 0 : i32
    %c0_i32_0 = arith.constant 0 : i32
    return %arg0, %c0_i32 : i32, i32
  }
  func.func @transform_2(%arg0: i32, %arg1: i32) -> (i32, i32) {
    %c0_i32 = arith.constant 0 : i32
    %c0_i32_0 = arith.constant 0 : i32
    return %arg0, %c0_i32 : i32, i32
  }
}

</mosaic_0001>

<bundles_post_ra>
// kernel: tpu_custom_call.1
= control target key start
LH: loop header
LB: loop body
LE: loop exit
PB: predicated region body
PF: predicated region fallthrough
CT: control target
= control target key end

     0   :  { %vm15_vm0 = vcmask 261120   ;;  %v49_v1 = vmov 0   ;;  %v13_v7 = vlaneseq  ;;  %vm37_vm2 = vcmask 7168   ;;  %s77_s0 = inlined_call_operand.vmem [shape: f32[8,32], index: 0, kind: input, shape index: {}]   ;;  %s78_s1 = inlined_call_operand.vmem [shape: s32[8,1], index: 1, kind: input, shape index: {}]   ;;  %s79_s2 = inlined_call_operand.vmem [shape: f32[8,1], index: 2, kind: output, shape index: {}]  }
   0x1   :  { %v12_v0 = vld [vmem:[%s77_s0] sm:$0xff]  ;;  %44 = vset.pattern.permute.xlu0 %v49_v1 }
   0x2   :  { %v16_v2 = vsel %vm15_vm0, %v12_v0, -inf  ;;  %v11_v3 = vld [vmem:[%s78_s1] sm:$0xff]  ;;  %v14_v8 = vand.u32 127, %v13_v7 }
   0x3   :  { %17 = vmax.xlane.f32.xlu0 %v16_v2 }
  0x19   :  { %26 = vperm.xlu0 %44, %v11_v3  }
  0x90   :  { %v18_v4 = vpop.xlane.xlu0 %17 }
  0x91   :  { %v19_v5 = vsub.f32 %v12_v0, %v18_v4 }
  0x93   :  { %v20_v6 = vmul.f32 1.442695, %v19_v5 }
  0x95   :  { %45 = vpow2.f32 %v20_v6 }
  0x98   :  { %v27_v9 = vpop.permute.xlu0 %26 }
  0x99   :  { %vm28_vm1 = vcmp.eq.s32.totalorder %v14_v8, %v27_v9 }
  0x9a   :  { %v29_v11 = vsel %vm28_vm1, %v12_v0, 0.0 }
  0x9b   :  { %v30_v13 = vsel %vm15_vm0, %v29_v11, 0.0 }
  0x9f   :  { %v46_v10 = vpop.eup %45 }
  0xa0   :  { %v22_v12 = vsel %vm15_vm0, %v46_v10, 0.0 }
  0xa1   :  { %23 = vadd.xlane.f32.xlu1 %v22_v12 }
  0xa5   :  { %31 = vadd.xlane.f32.xlu1 %v30_v13 }
 0x12e   :  { %v24_v14 = vpop.xlane.xlu1 %23 }
 0x12f   :  { %47 = vlog2.f32 %v24_v14 }
 0x132   :  { %v32_v17 = vpop.xlane.xlu1 %31 }
 0x139   :  { %v48_v15 = vpop.eup %47 }
 0x13a   :  { %v34_v16 = vmul.f32 0.6931472, %v48_v15 }
 0x13c   :  { %v35_v18 = vadd.f32 %v34_v16, %v18_v4 }
 0x13e   :  { %v36_v19 = vsub.f32 %v35_v18, %v32_v17 }
 0x140   :  { %38 = vst.msk [vmem:[%s79_s2] sm:$0xff] %vm37_vm2, %v36_v19 }

</bundles_post_ra>
